<compile_context>
chip_gen: v6e
topology: v6e:2x2x1
jax: 0.10.0
libtpu: 0.0.40
codegen_flags: <defaults>
</compile_context>

<pallas_src>
import jax
import jax.numpy as jnp
from jax.experimental import pallas as pl
from jax.experimental.pallas import tpu as pltpu

n_embd = 32
n_hidden = 2 * n_embd  # 64


def _round_up(x, m):
    return (x + m - 1) // m * m


def swiglu_kernel(beta_ref, x_ref, w_ref, b_ref, o_ref):
    # x_ref: (tm, 2H) folded row pairs; w_ref: (2H, 4H); b_ref: (1, 4H)
    # o_ref: (tm, 2H)  -- two logical output rows per folded row.
    Hw = o_ref.shape[-1]  # 2H = 128 lanes

    # One fused MXU matmul, K = 128 (full contraction depth), f32 accumulate.
    z = jnp.dot(x_ref[...], w_ref[...], preferred_element_type=jnp.float32)
    z = z + b_ref[...]                     # bias add in f32 (VPU)

    beta = beta_ref[0, 0]
    sw = z[:, :Hw]                         # swish-gate lanes (vreg-aligned slice)
    gl = z[:, Hw:]                         # glu-gate lanes   (vreg-aligned slice)
    out = sw * jax.nn.sigmoid(beta * sw) * gl   # EUP sigmoid only on swish half

    o_ref[...] = out.astype(o_ref.dtype)   # lane-dense (128-wide) store


def prepare_swiglu_params(w_swish, b_swish, beta, w_glu, b_glu,
                          compute_dtype=jnp.bfloat16):
    """One-time (init-time) parameter prep.

    PyTorch nn.Linear layout (out, in) -> row-pair-folded block-diagonal
    fused weight of shape (2H, 4H):
        [[Ws^T, 0,    Wg^T, 0   ],
         [0,    Ws^T, 0,    Wg^T]]
    and fused bias (1, 4H) = [bs, bs, bg, bg].
    """
    H = w_swish.shape[0]
    ws_t = jnp.asarray(w_swish, jnp.float32).T     # (H, H), used as x @ ws_t
    wg_t = jnp.asarray(w_glu, jnp.float32).T
    zero = jnp.zeros((H, H), jnp.float32)
    w_fused = jnp.concatenate(
        [jnp.concatenate([ws_t, zero, wg_t, zero], axis=1),
         jnp.concatenate([zero, ws_t, zero, wg_t], axis=1)],
        axis=0).astype(compute_dtype)              # (2H, 4H)
    bs = jnp.asarray(b_swish, jnp.float32)
    bg = jnp.asarray(b_glu, jnp.float32)
    b_fused = jnp.concatenate([bs, bs, bg, bg]).reshape(1, 4 * H)  # f32
    beta_arr = jnp.asarray(beta, jnp.float32).reshape(1, 1)
    return w_fused, b_fused, beta_arr


def swiglu(x, w_fused, b_fused, beta_arr, *, tm=4096, out_dtype=None):
    """x: (..., H). Params from prepare_swiglu_params().

    tm is the folded-row tile (each folded row = 2 logical rows of H lanes).
    out_dtype lets callers request bf16 output to cut HBM write traffic.
    """
    H2 = w_fused.shape[0]          # 2H (folded lane width)
    H = H2 // 2
    out_dtype = x.dtype if out_dtype is None else out_dtype

    orig_shape = x.shape
    x2d = x.reshape(-1, H)
    M = x2d.shape[0]

    # Fold pairs of rows into the lane dimension: (M, H) -> (Mf, 2H).
    Mf = pl.cdiv(M, 2)
    tm_f = max(8, min(_round_up(tm, 8), _round_up(Mf, 8)))
    Mf_pad = _round_up(Mf, tm_f)
    M_pad = 2 * Mf_pad
    if M_pad != M:
        x2d = jnp.pad(x2d, ((0, M_pad - M), (0, 0)))
    # Matmul-input dtype follows the (pre-cast) fused weight dtype.
    xf = x2d.reshape(Mf_pad, H2).astype(w_fused.dtype)

    grid = (Mf_pad // tm_f,)

    out_f = pl.pallas_call(
        swiglu_kernel,
        out_shape=jax.ShapeDtypeStruct((Mf_pad, H2), out_dtype),
        grid_spec=pltpu.PrefetchScalarGridSpec(
            num_scalar_prefetch=0,
            grid=grid,
            in_specs=[
                pl.BlockSpec((1, 1), lambda i: (0, 0),
                             memory_space=pltpu.SMEM),              # beta
                pl.BlockSpec((tm_f, H2), lambda i: (i, 0)),         # x tile
                pl.BlockSpec((H2, 2 * H2), lambda i: (0, 0)),       # fused W (resident)
                pl.BlockSpec((1, 2 * H2), lambda i: (0, 0)),        # fused bias (resident)
            ],
            out_specs=pl.BlockSpec((tm_f, H2), lambda i: (i, 0)),
        ),
        compiler_params=pltpu.CompilerParams(
            dimension_semantics=("parallel",)),
    )(beta_arr, xf, w_fused, b_fused)

    # (Mf_pad, 2H) row-major == (M_pad, H): free reinterpretation.
    out2d = out_f.reshape(M_pad, H)
    if M_pad != M:
        out2d = out2d[:M]          # drop padded-row garbage; do not remove
    return out2d.reshape(orig_shape)


def swiglu_ref(x, w_swish, b_swish, beta, w_glu, b_glu):
    swish_x = x @ w_swish.T + b_swish
    swish = swish_x * jax.nn.sigmoid(beta * swish_x)
    glu = x @ w_glu.T + b_glu
    return swish * glu


if __name__ == "__main__":
    key = jax.random.PRNGKey(0)
    k_x, k_ws, k_bs, k_beta, k_wg, k_bg = jax.random.split(key, 6)

    B, T, H = 2, 8, n_hidden  # input: (batch=2, seq=8, n_hidden=64)
    x = jax.random.normal(k_x, (B, T, H), dtype=jnp.float32)

    # Deterministic synthetic parameters (PyTorch nn.Linear shapes: (out, in)).
    w_swish = jax.random.normal(k_ws, (H, H), dtype=jnp.float32) * 0.05
    b_swish = jax.random.normal(k_bs, (H,), dtype=jnp.float32) * 0.05
    beta = jax.random.normal(k_beta, (1,), dtype=jnp.float32)
    w_glu = jax.random.normal(k_wg, (H, H), dtype=jnp.float32) * 0.05
    b_glu = jax.random.normal(k_bg, (H,), dtype=jnp.float32) * 0.05

    ref = swiglu_ref(x, w_swish, b_swish, beta[0], w_glu, b_glu)

    # bf16 matmul-input path (default; halves HBM traffic, native MXU dtype).
    params_bf16 = prepare_swiglu_params(w_swish, b_swish, beta, w_glu, b_glu,
                                        compute_dtype=jnp.bfloat16)
    out_bf16 = jax.block_until_ready(swiglu(x, *params_bf16))
    assert out_bf16.shape == x.shape
    assert jnp.allclose(out_bf16, ref, atol=2e-2, rtol=2e-2), \
        "bf16 path mismatch vs reference"

    # f32 path: validates the folded block-diagonal matmul at tight tolerance.
    params_f32 = prepare_swiglu_params(w_swish, b_swish, beta, w_glu, b_glu,
                                       compute_dtype=jnp.float32)
    out_f32 = jax.block_until_ready(swiglu(x, *params_f32))
    assert jnp.allclose(out_f32, ref, atol=1e-5, rtol=1e-5), \
        "f32 path mismatch vs reference"

    # bf16 output option (cuts the largest HBM stream; loose tolerance).
    out_bf16_out = jax.block_until_ready(
        swiglu(x, *params_bf16, out_dtype=jnp.bfloat16))
    assert out_bf16_out.dtype == jnp.bfloat16
    assert jnp.allclose(out_bf16_out.astype(jnp.float32), ref,
                        atol=5e-2, rtol=5e-2), "bf16-output path mismatch"

    print("KERNEL_OK")
</pallas_src>

<mosaic_0001>
module attributes {stable_mosaic.version = 11 : i64} {
  func.func @swiglu_kernel(%arg0: i32, %arg1: memref<1x1xf32, #tpu.memory_space<smem>>, %arg2: memref<8x128xbf16, #tpu.memory_space<vmem>>, %arg3: memref<128x256xbf16, #tpu.memory_space<vmem>>, %arg4: memref<1x256xf32, #tpu.memory_space<vmem>>, %arg5: memref<8x128xf32, #tpu.memory_space<vmem>>) attributes {dimension_semantics = [#tpu.dimension_semantics<parallel>], iteration_bounds = array<i64: 1>, scalar_prefetch = 0 : i64, scratch_operands = 0 : i64, tpu.core_type = #tpu.core_type<tc>, window_params = [{transform_indices = @transform_0, window_bounds = array<i64: 1, 1>}, {transform_indices = @transform_1, window_bounds = array<i64: 8, 128>}, {pipeline_mode = #tpu.pipeline_mode<synchronous>, transform_indices = @transform_2, window_bounds = array<i64: 128, 256>}, {pipeline_mode = #tpu.pipeline_mode<synchronous>, transform_indices = @transform_3, window_bounds = array<i64: 1, 256>}, {transform_indices = @transform_4, window_bounds = array<i64: 8, 128>}]} {
    %c0 = arith.constant 0 : index
    %c0_0 = arith.constant 0 : index
    %0 = vector.load %arg2[%c0, %c0_0] : memref<8x128xbf16, #tpu.memory_space<vmem>>, vector<8x128xbf16>
    %c0_1 = arith.constant 0 : index
    %c0_2 = arith.constant 0 : index
    %1 = vector.load %arg3[%c0_1, %c0_2] : memref<128x256xbf16, #tpu.memory_space<vmem>>, vector<128x256xbf16>
    %cst = arith.constant dense<0.000000e+00> : vector<8x256xf32>
    %2 = tpu.matmul %0, %1, %cst {dimension_numbers = #tpu.dot_dimension_numbers<[1], [0], [0], [1], [0, 0, 1, 1], [], []>} : vector<8x128xbf16>, vector<128x256xbf16>, vector<8x256xf32> -> vector<8x256xf32>
    %c0_3 = arith.constant 0 : index
    %c0_4 = arith.constant 0 : index
    %3 = vector.load %arg4[%c0_3, %c0_4] : memref<1x256xf32, #tpu.memory_space<vmem>>, vector<1x256xf32>
    %4 = vector.broadcast %3 : vector<1x256xf32> to vector<8x256xf32>
    %5 = arith.addf %2, %4 : vector<8x256xf32>
    %c0_5 = arith.constant 0 : index
    %c0_6 = arith.constant 0 : index
    %6 = memref.load %arg1[%c0_5, %c0_6] : memref<1x1xf32, #tpu.memory_space<smem>>
    %7 = vector.extract_strided_slice %5 {offsets = [0, 0], sizes = [8, 128], strides = [1, 1]} : vector<8x256xf32> to vector<8x128xf32>
    %8 = vector.extract_strided_slice %5 {offsets = [0, 128], sizes = [8, 128], strides = [1, 1]} : vector<8x256xf32> to vector<8x128xf32>
    %9 = vector.broadcast %6 : f32 to vector<8x128xf32>
    %10 = arith.mulf %9, %7 : vector<8x128xf32>
    %11 = arith.negf %10 : vector<8x128xf32>
    %12 = math.exp %11 : vector<8x128xf32>
    %cst_7 = arith.constant 1.000000e+00 : f32
    %13 = vector.broadcast %cst_7 : f32 to vector<8x128xf32>
    %14 = arith.addf %13, %12 : vector<8x128xf32>
    %15 = arith.divf %13, %14 : vector<8x128xf32>
    %16 = arith.mulf %7, %15 : vector<8x128xf32>
    %17 = arith.mulf %16, %8 : vector<8x128xf32>
    %c0_8 = arith.constant 0 : index
    %c0_9 = arith.constant 0 : index
    %18 = vector.load %arg5[%c0_8, %c0_9] : memref<8x128xf32, #tpu.memory_space<vmem>>, vector<8x128xf32>
    tpu.vector_store %arg5[%c0_8, %c0_9], %17 {strides = array<i32>} : memref<8x128xf32, #tpu.memory_space<vmem>>, vector<8x128xf32>,
    return
  }
  func.func @transform_0(%arg0: i32) -> (i32, i32) {
    %c0_i32 = arith.constant 0 : i32
    %c0_i32_0 = arith.constant 0 : i32
    %c0_i32_1 = arith.constant 0 : i32
    return %c0_i32, %c0_i32_0 : i32, i32
  }
  func.func @transform_1(%arg0: i32) -> (i32, i32) {
    %c0_i32 = arith.constant 0 : i32
    %c0_i32_0 = arith.constant 0 : i32
    return %arg0, %c0_i32 : i32, i32
  }
  func.func @transform_2(%arg0: i32) -> (i32, i32) {
    %c0_i32 = arith.constant 0 : i32
    %c0_i32_0 = arith.constant 0 : i32
    %c0_i32_1 = arith.constant 0 : i32
    return %c0_i32, %c0_i32_0 : i32, i32
  }
  func.func @transform_3(%arg0: i32) -> (i32, i32) {
    %c0_i32 = arith.constant 0 : i32
    %c0_i32_0 = arith.constant 0 : i32
    %c0_i32_1 = arith.constant 0 : i32
    return %c0_i32, %c0_i32_0 : i32, i32
  }
  func.func @transform_4(%arg0: i32) -> (i32, i32) {
    %c0_i32 = arith.constant 0 : i32
    %c0_i32_0 = arith.constant 0 : i32
    return %arg0, %c0_i32 : i32, i32
  }
}

</mosaic_0001>

<bundles_post_ra>
// kernel: tpu_custom_call.1
= control target key start
LH: loop header
LB: loop body
LE: loop exit
PB: predicated region body
PF: predicated region fallthrough
CT: control target
= control target key end

     0   :  { %10 = vsyncpa [#allocation4], 0  ;;  %s387_s0 = inlined_call_operand.<no memory space> [shape: f32[1,1], index: 0, kind: input, shape index: {}]   ;;  %s388_s1 = inlined_call_operand.hbm [shape: bf16[8,128], index: 1, kind: input, shape index: {}]   ;;  %s389_s2 = inlined_call_operand.hbm [shape: bf16[128,256], index: 2, kind: input, shape index: {}]   ;;  %s390_s3 = inlined_call_operand.vmem [shape: f32[1,256], index: 3, kind: input, shape index: {}]   ;;  %s391_s4 = inlined_call_operand.hbm [shape: f32[8,128], index: 4, kind: output, shape index: {}]  }
   0x1   :  { %11 = vsyncpa [#allocation7], 0 }
   0x2   :  { %12 = vsyncpa [#allocation5], 0  ;;  %s341_s15 = smov [#allocation3]   ;;  %s342_s17 = smov [#allocation6]  }
   0x3   :  { %s21_s16 = sshll.u32 %s341_s15, 4  ;;  %s30_s18 = sshll.u32 %s342_s17, 4  ;;  %s22_s16 = int_to_ptr.vmem [resolvable:$true] %s21_s16  ;;  %s31_s18 = int_to_ptr.vmem [resolvable:$true] %s30_s18 }
   0x4   :  { %s283_s19 = scalar_lea.vmem %s22_s16, 64  ;;  %p288_p1 = scmp.lt.s32.totalorder %s22_s16, %s22_s16 }
   0x5   :  { %p284_p0 = scmp.ne.s32.totalorder %s22_s16, %s283_s19  ;;  %p289_p2 = scmp.lt.s32.totalorder %s283_s19, %s283_s19 }
   0x7   :  { %p290_p3 = por %p289_p2, %p288_p1 }
   0x9   :  { %p291_p4 = pnand %p290_p3, %p284_p0 }
   0xb   :  { %294 = shalt.err (!%p291_p4)
}
   0xc   :  { %24 = dma.hbm_to_vmem [thread:$0]  %s388_s1, 64, %s22_s16, [#allocation4]  }
   0xd   :  { %s303_s22 = scalar_lea.vmem %s31_s18, 2048  ;;  %p308_p6 = scmp.lt.s32.totalorder %s31_s18, %s31_s18 }
   0xe   :  { %p304_p5 = scmp.ne.s32.totalorder %s31_s18, %s303_s22  ;;  %p309_p7 = scmp.lt.s32.totalorder %s303_s22, %s303_s22 }
  0x10   :  { %p310_p8 = por %p309_p7, %p308_p6 }
  0x12   :  { %p311_p9 = pnand %p310_p8, %p304_p5 }
  0x14   :  { %314 = shalt.err (!%p311_p9)
}
  0x15   :  { %s343_s23 = smov 128   ;;  %s344_s24 = smov 8  }
  0x16   :  { %36 = dma.hbm_to_vmem [thread:$0]  %s389_s2, 2048, %s31_s18, [#allocation7], %s343_s23, %s343_s23, %s344_s24  }
  0x17   :  { %335 = dma.done.wait [#allocation4], 64  }
  0x18   :  { %336 = vsyncadd [#allocation4], 4294967232 }
  0x19   :  { %337 = dma.done.wait [#allocation7], 2048  }
  0x1a   :  { %338 = vsyncadd [#allocation7], 4294965248  ;;  %v345_v0 = vmov 0   ;;  %v247_v1 = vld [vmem:[#allocation6 + $0x74] ss:$8 sps:$4 sm:$0xff]   ;;  %v65_v18 = vlaneseq  ;;  %v197_v24 = vstv %s387_s0 }
  0x1b   :  { %187 = vmatprep.mubr.bf16.mxu0 %v345_v0  ;;  %v249_v2 = vld [vmem:[#allocation6 + $0x70] ss:$8 sps:$4 sm:$0xff]   ;;  %155 = vmatprep.subr.bf16.mxu0 %v247_v1  ;;  %v250_v3 = vld [vmem:[#allocation6 + $0x64] ss:$8 sps:$4 sm:$0xff]   ;;  %v252_v4 = vld [vmem:[#allocation6 + $0x60] ss:$8 sps:$4 sm:$0xff]  }
  0x1c   :  { %156 = vmatpush1.bf16.msra.mxu0 %v249_v2  ;;  %v253_v5 = vld [vmem:[#allocation6 + $0x54] ss:$8 sps:$4 sm:$0xff]   ;;  %v255_v6 = vld [vmem:[#allocation6 + $0x50] ss:$8 sps:$4 sm:$0xff]   ;;  %v256_v7 = vld [vmem:[#allocation6 + $0x44] ss:$8 sps:$4 sm:$0xff]  }
  0x1d   :  { %157 = vmatprep.subr.bf16.mxu0 %v250_v3  ;;  %v258_v8 = vld [vmem:[#allocation6 + $0x40] ss:$8 sps:$4 sm:$0xff]   ;;  %v259_v9 = vld [vmem:[#allocation6 + $0x34] ss:$8 sps:$4 sm:$0xff]   ;;  %v261_v10 = vld [vmem:[#allocation6 + $0x30] ss:$8 sps:$4 sm:$0xff]  }
  0x1e   :  { %v262_v11 = vld [vmem:[#allocation6 + $0x24] ss:$8 sps:$4 sm:$0xff]   ;;  %v264_v12 = vld [vmem:[#allocation6 + $0x20] ss:$8 sps:$4 sm:$0xff]   ;;  %v265_v13 = vld [vmem:[#allocation6 + $0x14] ss:$8 sps:$4 sm:$0xff]  }
  0x1f   :  { %v267_v14 = vld [vmem:[#allocation6 + $0x10] ss:$8 sps:$4 sm:$0xff]   ;;  %v268_v15 = vld [vmem:[#allocation6 + $0x4] ss:$8 sps:$4 sm:$0xff]   ;;  %v270_v16 = vld [vmem:[#allocation6] ss:$8 sps:$4 sm:$0xff]  }
  0x20   :  { %158 = vmatpush1.bf16.msra.mxu0 %v252_v4  ;;  %v46_v17 = vld [vmem:[#allocation3] sm:$0xf]  ;;  %v66_v19 = vshrl.u32 %v65_v18, 7 }
  0x21   :  { %159 = vmatprep.subr.bf16.mxu0 %v253_v5  ;;  %v63_v21 = vld [vmem:[%s390_s3] sm:$0x3]  ;;  %s346_s3 = smov [#allocation8]  }
  0x22   :  { %v67_v20 = vsub.s32 0, %v66_v19  ;;  %v71_v33 = vsub.s32 1, %v66_v19  ;;  %s214_s29 = sshll.u32 %s346_s3, 4  ;;  %s215_s29 = int_to_ptr.vmem [resolvable:$true] %s214_s29 }
  0x23   :  { %s315_s0 = scalar_lea.vmem %s215_s29, 128  ;;  %p320_p11 = scmp.lt.s32.totalorder %s215_s29, %s215_s29 }
  0x24   :  { %160 = vmatpush1.bf16.msra.mxu0 %v255_v6  ;;  %v68_v22 = vrot.slane %v63_v21, %v67_v20  ;;  %v72_v34 = vrot.slane %v63_v21, %v71_v33  ;;  %p316_p10 = scmp.ne.s32.totalorder %s215_s29, %s315_s0  ;;  %p321_p12 = scmp.lt.s32.totalorder %s315_s0, %s315_s0 }
  0x25   :  { %161 = vmatprep.subr.bf16.mxu0 %v256_v7 }
  0x26   :  { %p322_p13 = por %p321_p12, %p320_p11 }
  0x28   :  { %162 = vmatpush1.bf16.msra.mxu0 %v258_v8  ;;  %p323_p0 = pnand %p322_p13, %p316_p10 }
  0x29   :  { %163 = vmatprep.subr.bf16.mxu0 %v259_v9 }
  0x2c   :  { %164 = vmatpush1.bf16.msra.mxu0 %v261_v10 }
  0x2d   :  { %165 = vmatprep.subr.bf16.mxu0 %v262_v11 }
  0x30   :  { %166 = vmatpush1.bf16.msra.mxu0 %v264_v12 }
  0x31   :  { %167 = vmatprep.subr.bf16.mxu0 %v265_v13 }
  0x34   :  { %168 = vmatpush1.bf16.msra.mxu0 %v267_v14 }
  0x35   :  { %169 = vmatprep.subr.bf16.mxu0 %v268_v15 }
  0x38   :  { %170 = vmatpush1.bf16.msra.mxu0 %v270_v16 }
  0x3b   :  { %188 = vmatmul.mubr.bf16.vlgmr.msra.gmra.mxu0 %v46_v17 }
  0xfb   :  { %v189_v23 = vpop.f32.mrf.mxu0 }
  0xfc   :  { %v190_v25 = vadd.f32 %v189_v23, %v68_v22 }
  0xfd   :  { %v191_v26 = vpop.f32.mrf.mxu0 }
  0xfe   :  { %v198_v27 = vmul.f32 %v197_v24, %v190_v25  ;;  %v192_v37 = vadd.f32 %v191_v26, %v72_v34 }
  0xff   :  { %v193_v28 = vpop.f32.mrf.mxu0 }
 0x100   :  { %v240_v29 = vmul.f32 -1.442695, %v198_v27 }
 0x101   :  { %v194_v30 = vpop.f32.mrf.mxu0 }
 0x102   :  { %271 = vpow2.f32 %v240_v29 }
 0x10f   :  { %v272_v31 = vpop.eup %271 }
 0x110   :  { %v202_v32 = vadd.f32 1.0, %v272_v31 }
 0x112   :  { %273 = vrcp.f32 %v202_v32 }
 0x11f   :  { %v274_v35 = vpop.eup %273 }
 0x120   :  { %v205_v36 = vmul.f32 %v274_v35, %v190_v25 }
 0x122   :  { %v206_v38 = vmul.f32 %v205_v36, %v192_v37 }
 0x124   :  { %207 = vst [vmem:[#allocation8] sm:$0xff] %v206_v38 }
 0x125   :  { %326 = shalt.err (!%p323_p0)
}
 0x126   :  { %217 = dma.vmem_to_hbm [thread:$0]  %s215_s29, 128, %s391_s4, [#allocation5]  }
 0x127   :  { %339 = dma.done.wait [#allocation5], 128  }
 0x128   :  { %340 = vsyncadd [#allocation5], 4294967168 }
 0x129   :  { %221 = vsyncpa [#allocation4], 1 }
 0x12a   :  { %222 = vsyncpa [#allocation7], 1 }
 0x12b   :  { %223 = vsyncpa [#allocation5], 1 }

</bundles_post_ra>
